<compile_context>
chip_gen: v5e
topology: v5e:2x2
jax: 0.10.0
libtpu: 0.0.40
codegen_flags: <defaults>
</compile_context>

<pallas_src>
import functools
import math

import jax
import jax.numpy as jnp
from jax.experimental import pallas as pl
from jax.experimental.pallas import tpu as pltpu

LANE = 128  # last-dim (lane) alignment


def _round_up(x: int, m: int) -> int:
    return (x + m - 1) // m * m


def _sublane(dtype) -> int:
    """Native sublane packing for the second-to-last dim (f32:8, bf16:16, i8:32)."""
    return max(8, 32 // jnp.dtype(dtype).itemsize)


def _fused_mlp_kernel(*refs, n_layers: int):
    """Fused [Linear(+ReLU)]* -> Linear over one batch tile.

    refs = (x_ref, w0_ref, b0_ref, w1_ref, b1_ref, ..., o_ref)
    Feature dims are pre-padded to multiples of 128 (lane-dense MXU matmuls
    and unmasked stores).  Dot accumulation is f32; activations stay in the
    weight dtype between layers (downcast folded into the ReLU).
    """
    x_ref = refs[0]
    o_ref = refs[-1]
    wb = refs[1:-1]

    w_dtype = wb[0].dtype
    h = x_ref[...]
    if h.dtype != w_dtype:          # trace-time branch; normally a no-op
        h = h.astype(w_dtype)

    for i in range(n_layers):
        w_ref = wb[2 * i]
        b_ref = wb[2 * i + 1]
        acc = jnp.dot(h, w_ref[...], preferred_element_type=jnp.float32)
        acc = acc + b_ref[...].astype(jnp.float32)   # (1, fout_pad) broadcasts
        if i != n_layers - 1:
            # ReLU + downcast to the next matmul's input dtype in one pass.
            h = jnp.maximum(acc, 0.0).astype(w_dtype)
        else:
            h = acc
    o_ref[...] = h.astype(o_ref.dtype)


@functools.partial(jax.jit, static_argnames=("output_size",))
def galaga_nn_forward(x, params, output_size: int):
    """Forward pass of GalagaNN as a single fused pallas_call.

    x:       (batch, input_size)
    params:  list of (W_padded (fin_pad, fout_pad), b_padded (1, fout_pad))
    Returns  (batch, output_size)
    """
    batch, fin = x.shape
    fin_pad = params[0][0].shape[0]
    fout_pad = params[-1][0].shape[1]
    n_layers = len(params)
    param_dtype = params[0][0].dtype

    if x.dtype != param_dtype:
        x = x.astype(param_dtype)

    sub = _sublane(param_dtype)

    # Batch tiling: one tile for small batches; 256-row tiles for large ones
    # (fills the 256-wide MXU on v6e/v7x, multiple of v5e's 128-wide MXU,
    # amortizes ~0.35 us per-grid-step overhead).
    if batch <= 256:
        tm = _round_up(batch, sub)
        batch_pad = tm
    else:
        tm = 256
        batch_pad = _round_up(batch, tm)
    grid = (batch_pad // tm,)

    # Only materialize a padded copy of x when needed (the pad is an extra
    # XLA op with a full HBM read+write of the activations).
    if batch_pad != batch or fin_pad != fin:
        x_in = jnp.zeros((batch_pad, fin_pad), param_dtype).at[:batch, :fin].set(x)
    else:
        x_in = x

    def _pinned(i):  # weights/biases: same block for every batch tile
        return (0, 0)

    flat_params = []
    in_specs = [pl.BlockSpec((tm, fin_pad), lambda i: (i, 0))]
    widest = fin_pad
    weight_bytes = 0
    for w, b in params:
        flat_params += [w, b]
        widest = max(widest, w.shape[1])
        weight_bytes += w.size * w.dtype.itemsize + b.size * b.dtype.itemsize
        # Pinned + single-buffered: the block index never changes, so one
        # buffer suffices -> halves the weight set's VMEM footprint.
        in_specs.append(
            pl.BlockSpec(w.shape, _pinned, pipeline_mode=pl.Buffered(1)))
        in_specs.append(
            pl.BlockSpec(b.shape, _pinned, pipeline_mode=pl.Buffered(1)))

    # Explicit VMEM budget: resident weights (1 buffer each) + double-buffered
    # x/out tiles + f32 intermediate of the widest layer, with 25% + 4 MiB
    # slack.  Floor 16 MiB, cap 64 MiB (valid on v5e/v6e/v7x per-TC).
    itemsize = jnp.dtype(param_dtype).itemsize
    act_bytes = 2 * tm * (fin_pad + fout_pad) * itemsize
    scratch_bytes = 2 * tm * widest * 4
    vmem_limit = int(1.25 * (weight_bytes + act_bytes + scratch_bytes)) + (4 << 20)
    vmem_limit = min(max(vmem_limit, 16 << 20), 64 << 20)
    # TODO(synk): if the resident weight set approaches ~50 MiB (v7x per-TC
    # budget), switch to streaming weights from HBM (memory_space=pl.ANY +
    # make_async_copy double-buffering over K/N tiles) instead of pinning.
    # TODO(synk): for the grid=(1,) small-batch latency regime, prefetch layer
    # i+1's weights with a manual DMA while computing layer i.

    kernel = functools.partial(_fused_mlp_kernel, n_layers=n_layers)
    out_pad = pl.pallas_call(
        kernel,
        out_shape=jax.ShapeDtypeStruct((batch_pad, fout_pad), param_dtype),
        grid=grid,
        in_specs=in_specs,
        out_specs=pl.BlockSpec((tm, fout_pad), lambda i: (i, 0)),
        compiler_params=pltpu.CompilerParams(
            dimension_semantics=("parallel",),  # v7x: batch tiles over 2 TCs
            vmem_limit_bytes=vmem_limit,
        ),
    )(x_in, *flat_params)

    if batch_pad != batch or fout_pad != output_size:
        return out_pad[:batch, :output_size]
    return out_pad


def init_galaga_params(key, input_size, hidden_layers, output_size,
                       dtype=jnp.float32):
    """Parameter init mirroring nn.Linear defaults, stored padded for the kernel.

    Returns (padded_params, raw_params):
      padded_params: [(W (fin_pad, fout_pad), b (1, fout_pad))] in `dtype`,
                     zero-padded to multiples of 128 on both feature dims.
      raw_params:    [(W (fin, fout), b (fout,))] in f32, for reference math.
    """
    sizes = [input_size] + list(hidden_layers) + [output_size]
    padded, raw = [], []
    for i in range(len(sizes) - 1):
        fan_in, fan_out = sizes[i], sizes[i + 1]
        key, kw, kb = jax.random.split(key, 3)
        bound = 1.0 / math.sqrt(fan_in)
        w = jax.random.uniform(kw, (fan_in, fan_out), jnp.float32, -bound, bound)
        b = jax.random.uniform(kb, (fan_out,), jnp.float32, -bound, bound)
        raw.append((w, b))

        fin_pad = _round_up(fan_in, LANE)
        fout_pad = _round_up(fan_out, LANE)
        w_pad = (jnp.zeros((fin_pad, fout_pad), dtype)
                 .at[:fan_in, :fan_out].set(w.astype(dtype)))
        b_pad = (jnp.zeros((1, fout_pad), dtype)
                 .at[0, :fan_out].set(b.astype(dtype)))
        padded.append((w_pad, b_pad))
    return padded, raw


if __name__ == "__main__":
    # Small shapes consistent with the module: an MLP over a feature vector.
    batch = 2
    input_size = 32
    hidden_layers = [64, 32]
    output_size = 8

    key = jax.random.PRNGKey(0)
    key, kx = jax.random.split(key)
    x = jax.random.normal(kx, (batch, input_size), jnp.float32)

    # Plain-JAX reference (same math, unpadded f32 params).
    params_f32, raw = init_galaga_params(
        key, input_size, hidden_layers, output_size, dtype=jnp.float32)
    ref = x
    for i, (w, b) in enumerate(raw):
        ref = ref @ w + b
        if i != len(raw) - 1:
            ref = jnp.maximum(ref, 0.0)

    # 1) f32 params: tight correctness check of the fused kernel.
    out = galaga_nn_forward(x, params_f32, output_size)
    out = jax.block_until_ready(out)
    assert out.shape == (batch, output_size)
    assert jnp.allclose(out, ref, atol=1e-4, rtol=1e-4)

    # 2) bf16 params/activations (MXU-native storage, f32 accumulation):
    #    looser tolerance vs. the f32 reference due to bf16 rounding.
    params_bf16, _ = init_galaga_params(
        key, input_size, hidden_layers, output_size, dtype=jnp.bfloat16)
    out_bf16 = galaga_nn_forward(x.astype(jnp.bfloat16), params_bf16, output_size)
    out_bf16 = jax.block_until_ready(out_bf16)
    assert out_bf16.shape == (batch, output_size)
    assert jnp.allclose(out_bf16.astype(jnp.float32), ref, atol=0.1, rtol=0.1)

    print("KERNEL_OK")
</pallas_src>

<mosaic_0001>
module attributes {stable_mosaic.version = 11 : i64} {
  func.func @_fused_mlp_kernel(%arg0: i32, %arg1: memref<8x128xf32, #tpu.memory_space<vmem>>, %arg2: memref<128x128xf32, #tpu.memory_space<vmem>>, %arg3: memref<1x128xf32, #tpu.memory_space<vmem>>, %arg4: memref<128x128xf32, #tpu.memory_space<vmem>>, %arg5: memref<1x128xf32, #tpu.memory_space<vmem>>, %arg6: memref<128x128xf32, #tpu.memory_space<vmem>>, %arg7: memref<1x128xf32, #tpu.memory_space<vmem>>, %arg8: memref<8x128xf32, #tpu.memory_space<vmem>>) attributes {dimension_semantics = [#tpu.dimension_semantics<parallel>], iteration_bounds = array<i64: 1>, scalar_prefetch = 0 : i64, scratch_operands = 0 : i64, tpu.core_type = #tpu.core_type<tc>, window_params = [{transform_indices = @transform_0, window_bounds = array<i64: 8, 128>}, {pipeline_mode = #tpu.pipeline_mode<synchronous>, transform_indices = @transform_1, window_bounds = array<i64: 128, 128>}, {pipeline_mode = #tpu.pipeline_mode<synchronous>, transform_indices = @transform_2, window_bounds = array<i64: 1, 128>}, {pipeline_mode = #tpu.pipeline_mode<synchronous>, transform_indices = @transform_3, window_bounds = array<i64: 128, 128>}, {pipeline_mode = #tpu.pipeline_mode<synchronous>, transform_indices = @transform_4, window_bounds = array<i64: 1, 128>}, {pipeline_mode = #tpu.pipeline_mode<synchronous>, transform_indices = @transform_5, window_bounds = array<i64: 128, 128>}, {pipeline_mode = #tpu.pipeline_mode<synchronous>, transform_indices = @transform_6, window_bounds = array<i64: 1, 128>}, {transform_indices = @transform_7, window_bounds = array<i64: 8, 128>}]} {
    %c0 = arith.constant 0 : index
    %c0_0 = arith.constant 0 : index
    %0 = vector.load %arg1[%c0, %c0_0] : memref<8x128xf32, #tpu.memory_space<vmem>>, vector<8x128xf32>
    %c0_1 = arith.constant 0 : index
    %c0_2 = arith.constant 0 : index
    %1 = vector.load %arg2[%c0_1, %c0_2] : memref<128x128xf32, #tpu.memory_space<vmem>>, vector<128x128xf32>
    %cst = arith.constant dense<0.000000e+00> : vector<8x128xf32>
    %2 = tpu.matmul %0, %1, %cst {dimension_numbers = #tpu.dot_dimension_numbers<[1], [0], [0], [1], [0, 0, 1, 1], [], []>} : vector<8x128xf32>, vector<128x128xf32>, vector<8x128xf32> -> vector<8x128xf32>
    %c0_3 = arith.constant 0 : index
    %c0_4 = arith.constant 0 : index
    %3 = vector.load %arg3[%c0_3, %c0_4] : memref<1x128xf32, #tpu.memory_space<vmem>>, vector<1x128xf32>
    %4 = vector.broadcast %3 : vector<1x128xf32> to vector<8x128xf32>
    %5 = arith.addf %2, %4 : vector<8x128xf32>
    %cst_5 = arith.constant 0.000000e+00 : f32
    %6 = vector.broadcast %cst_5 : f32 to vector<8x128xf32>
    %7 = arith.maximumf %5, %6 : vector<8x128xf32>
    %c0_6 = arith.constant 0 : index
    %c0_7 = arith.constant 0 : index
    %8 = vector.load %arg4[%c0_6, %c0_7] : memref<128x128xf32, #tpu.memory_space<vmem>>, vector<128x128xf32>
    %cst_8 = arith.constant dense<0.000000e+00> : vector<8x128xf32>
    %9 = tpu.matmul %7, %8, %cst_8 {dimension_numbers = #tpu.dot_dimension_numbers<[1], [0], [0], [1], [0, 0, 1, 1], [], []>} : vector<8x128xf32>, vector<128x128xf32>, vector<8x128xf32> -> vector<8x128xf32>
    %c0_9 = arith.constant 0 : index
    %c0_10 = arith.constant 0 : index
    %10 = vector.load %arg5[%c0_9, %c0_10] : memref<1x128xf32, #tpu.memory_space<vmem>>, vector<1x128xf32>
    %11 = vector.broadcast %10 : vector<1x128xf32> to vector<8x128xf32>
    %12 = arith.addf %9, %11 : vector<8x128xf32>
    %cst_11 = arith.constant 0.000000e+00 : f32
    %13 = vector.broadcast %cst_11 : f32 to vector<8x128xf32>
    %14 = arith.maximumf %12, %13 : vector<8x128xf32>
    %c0_12 = arith.constant 0 : index
    %c0_13 = arith.constant 0 : index
    %15 = vector.load %arg6[%c0_12, %c0_13] : memref<128x128xf32, #tpu.memory_space<vmem>>, vector<128x128xf32>
    %cst_14 = arith.constant dense<0.000000e+00> : vector<8x128xf32>
    %16 = tpu.matmul %14, %15, %cst_14 {dimension_numbers = #tpu.dot_dimension_numbers<[1], [0], [0], [1], [0, 0, 1, 1], [], []>} : vector<8x128xf32>, vector<128x128xf32>, vector<8x128xf32> -> vector<8x128xf32>
    %c0_15 = arith.constant 0 : index
    %c0_16 = arith.constant 0 : index
    %17 = vector.load %arg7[%c0_15, %c0_16] : memref<1x128xf32, #tpu.memory_space<vmem>>, vector<1x128xf32>
    %18 = vector.broadcast %17 : vector<1x128xf32> to vector<8x128xf32>
    %19 = arith.addf %16, %18 : vector<8x128xf32>
    %c0_17 = arith.constant 0 : index
    %c0_18 = arith.constant 0 : index
    %20 = vector.load %arg8[%c0_17, %c0_18] : memref<8x128xf32, #tpu.memory_space<vmem>>, vector<8x128xf32>
    tpu.vector_store %arg8[%c0_17, %c0_18], %19 {strides = array<i32>} : memref<8x128xf32, #tpu.memory_space<vmem>>, vector<8x128xf32>,
    return
  }
  func.func @transform_0(%arg0: i32) -> (i32, i32) {
    %c0_i32 = arith.constant 0 : i32
    %c0_i32_0 = arith.constant 0 : i32
    return %arg0, %c0_i32 : i32, i32
  }
  func.func @transform_1(%arg0: i32) -> (i32, i32) {
    %c0_i32 = arith.constant 0 : i32
    %c0_i32_0 = arith.constant 0 : i32
    %c0_i32_1 = arith.constant 0 : i32
    return %c0_i32, %c0_i32_0 : i32, i32
  }
  func.func @transform_2(%arg0: i32) -> (i32, i32) {
    %c0_i32 = arith.constant 0 : i32
    %c0_i32_0 = arith.constant 0 : i32
    %c0_i32_1 = arith.constant 0 : i32
    return %c0_i32, %c0_i32_0 : i32, i32
  }
  func.func @transform_3(%arg0: i32) -> (i32, i32) {
    %c0_i32 = arith.constant 0 : i32
    %c0_i32_0 = arith.constant 0 : i32
    %c0_i32_1 = arith.constant 0 : i32
    return %c0_i32, %c0_i32_0 : i32, i32
  }
  func.func @transform_4(%arg0: i32) -> (i32, i32) {
    %c0_i32 = arith.constant 0 : i32
    %c0_i32_0 = arith.constant 0 : i32
    %c0_i32_1 = arith.constant 0 : i32
    return %c0_i32, %c0_i32_0 : i32, i32
  }
  func.func @transform_5(%arg0: i32) -> (i32, i32) {
    %c0_i32 = arith.constant 0 : i32
    %c0_i32_0 = arith.constant 0 : i32
    %c0_i32_1 = arith.constant 0 : i32
    return %c0_i32, %c0_i32_0 : i32, i32
  }
  func.func @transform_6(%arg0: i32) -> (i32, i32) {
    %c0_i32 = arith.constant 0 : i32
    %c0_i32_0 = arith.constant 0 : i32
    %c0_i32_1 = arith.constant 0 : i32
    return %c0_i32, %c0_i32_0 : i32, i32
  }
  func.func @transform_7(%arg0: i32) -> (i32, i32) {
    %c0_i32 = arith.constant 0 : i32
    %c0_i32_0 = arith.constant 0 : i32
    return %arg0, %c0_i32 : i32, i32
  }
}

</mosaic_0001>

<bundles_post_ra>
// kernel: galaga_nn_forward.1
= control target key start
LH: loop header
LB: loop body
LE: loop exit
PB: predicated region body
PF: predicated region fallthrough
CT: control target
= control target key end

     0   :  { %12 = vsyncpa [#allocation3], 0  ;;  %s356_s0 = inlined_call_operand.vmem [shape: f32[8,128], index: 0, kind: input, shape index: {}]   ;;  %s357_s1 = inlined_call_operand.hbm [shape: f32[128,128], index: 1, kind: input, shape index: {}]   ;;  %s358_s2 = inlined_call_operand.vmem [shape: f32[1,128], index: 2, kind: input, shape index: {}]   ;;  %s359_s3 = inlined_call_operand.hbm [shape: f32[128,128], index: 3, kind: input, shape index: {}]   ;;  %s360_s4 = inlined_call_operand.vmem [shape: f32[1,128], index: 4, kind: input, shape index: {}]   ;;  %s361_s5 = inlined_call_operand.hbm [shape: f32[128,128], index: 5, kind: input, shape index: {}]   ;;  %s362_s6 = inlined_call_operand.vmem [shape: f32[1,128], index: 6, kind: input, shape index: {}]   ;;  %s363_s7 = inlined_call_operand.vmem [shape: f32[8,128], index: 7, kind: output, shape index: {}]  }
   0x1   :  { %13 = vsyncpa [#allocation5], 0  ;;  %s35_s26 = sshll.u32 %s359_s3, 4  ;;  %s287_s27 = smov [#allocation4]   ;;  %s36_s26 = int_to_ptr.hbm [resolvable:$true] %s35_s26 }
   0x2   :  { %s37_s28 = sshll.u32 %s287_s27, 4  ;;  %s20_s8 = sshll.u32 %s357_s1, 4  ;;  %s38_s28 = int_to_ptr.vmem [resolvable:$true] %s37_s28  ;;  %s21_s8 = int_to_ptr.hbm [resolvable:$true] %s20_s8 }
   0x3   :  { %s288_s9 = smov 128   ;;  %s289_s10 = smov 8  }
   0x4   :  { %43 = dma.hbm_to_vmem [thread:$0]  %s36_s26, 2048, %s38_s28, [#allocation5], %s288_s9, %s288_s9, %s289_s10  }
   0x5   :  { %s290_s11 = smov [#allocation2]   ;;  %s50_s15 = sshll.u32 %s361_s5, 4  ;;  %s51_s15 = int_to_ptr.hbm [resolvable:$true] %s50_s15 }
   0x6   :  { %s22_s12 = sshll.u32 %s290_s11, 4  ;;  %s291_s3 = smov [#allocation6]   ;;  %s23_s12 = int_to_ptr.vmem [resolvable:$true] %s22_s12 }
   0x7   :  { %28 = dma.hbm_to_vmem [thread:$0]  %s21_s8, 2048, %s23_s12, [#allocation3], %s288_s9, %s288_s9, %s289_s10  }
   0x8   :  { %s52_s16 = sshll.u32 %s291_s3, 4  ;;  %s53_s16 = int_to_ptr.vmem [resolvable:$true] %s52_s16 }
   0x9   :  { %58 = dma.hbm_to_vmem [thread:$0]  %s51_s15, 2048, %s53_s16, [#allocation5], %s288_s9, %s288_s9, %s289_s10  }
   0xa   :  { %283 = dma.done.wait [#allocation3], 2048  }
   0xb   :  { %284 = vsyncadd [#allocation3], 4294965248 }
   0xc   :  { %285 = dma.done.wait [#allocation5], 4096  }
   0xd   :  { %286 = vsyncadd [#allocation5], 4294963200  ;;  %v89_v0 = vld [vmem:[#allocation2 + $0x78] sm:$0xff]  ;;  %v88_v1 = vld [vmem:[#allocation2 + $0x70] sm:$0xff] }
   0xe   :  { %94 = vmatpush.msra.mxu0 %v89_v0  ;;  %v87_v2 = vld [vmem:[#allocation2 + $0x68] sm:$0xff]  ;;  %v86_v3 = vld [vmem:[#allocation2 + $0x60] sm:$0xff]  ;;  %v130_v4 = vld [vmem:[#allocation4 + $0x78] sm:$0xff] }
   0xf   :  { %v85_v5 = vld [vmem:[#allocation2 + $0x58] sm:$0xff]  ;;  %135 = vmatpush.msra.mxu1 %v130_v4  ;;  %v129_v6 = vld [vmem:[#allocation4 + $0x70] sm:$0xff]  ;;  %v128_v7 = vld [vmem:[#allocation4 + $0x68] sm:$0xff] }
  0x10   :  { %95 = vmatpush.msra.mxu0 %v88_v1  ;;  %v84_v8 = vld [vmem:[#allocation2 + $0x50] sm:$0xff]  ;;  %v127_v9 = vld [vmem:[#allocation4 + $0x60] sm:$0xff]  ;;  %v83_v10 = vld [vmem:[#allocation2 + $0x48] sm:$0xff] }
  0x11   :  { %136 = vmatpush.msra.mxu1 %v129_v6  ;;  %v126_v11 = vld [vmem:[#allocation4 + $0x58] sm:$0xff]  ;;  %v82_v12 = vld [vmem:[#allocation2 + $0x40] sm:$0xff]  ;;  %v125_v13 = vld [vmem:[#allocation4 + $0x50] sm:$0xff] }
  0x12   :  { %96 = vmatpush.msra.mxu0 %v87_v2  ;;  %v81_v14 = vld [vmem:[#allocation2 + $0x38] sm:$0xff]  ;;  %v124_v15 = vld [vmem:[#allocation4 + $0x48] sm:$0xff]  ;;  %v80_v16 = vld [vmem:[#allocation2 + $0x30] sm:$0xff] }
  0x13   :  { %137 = vmatpush.msra.mxu1 %v128_v7  ;;  %v123_v17 = vld [vmem:[#allocation4 + $0x40] sm:$0xff]  ;;  %v79_v18 = vld [vmem:[#allocation2 + $0x28] sm:$0xff]  ;;  %v122_v19 = vld [vmem:[#allocation4 + $0x38] sm:$0xff] }
  0x14   :  { %97 = vmatpush.msra.mxu0 %v86_v3  ;;  %v78_v20 = vld [vmem:[#allocation2 + $0x20] sm:$0xff]  ;;  %v121_v21 = vld [vmem:[#allocation4 + $0x30] sm:$0xff]  ;;  %v77_v22 = vld [vmem:[#allocation2 + $0x18] sm:$0xff] }
  0x15   :  { %138 = vmatpush.msra.mxu1 %v127_v9  ;;  %v120_v23 = vld [vmem:[#allocation4 + $0x28] sm:$0xff]  ;;  %v76_v24 = vld [vmem:[#allocation2 + $0x10] sm:$0xff]  ;;  %v119_v25 = vld [vmem:[#allocation4 + $0x20] sm:$0xff] }
  0x16   :  { %98 = vmatpush.msra.mxu0 %v85_v5  ;;  %v75_v26 = vld [vmem:[#allocation2 + $0x8] sm:$0xff]  ;;  %v118_v27 = vld [vmem:[#allocation4 + $0x18] sm:$0xff]  ;;  %v74_v28 = vld [vmem:[#allocation2] sm:$0xff] }
  0x17   :  { %139 = vmatpush.msra.mxu1 %v126_v11  ;;  %v73_v29 = vld [vmem:[%s356_s0] sm:$0xff]  ;;  %v117_v30 = vld [vmem:[#allocation4 + $0x10] sm:$0xff]  ;;  %v116_v31 = vld [vmem:[#allocation4 + $0x8] sm:$0xff] }
  0x18   :  { %99 = vmatpush.msra.mxu0 %v84_v8  ;;  %v115_v32 = vld [vmem:[#allocation4] sm:$0xff]  ;;  %v171_v33 = vld [vmem:[#allocation6 + $0x78] sm:$0xff]  ;;  %v170_v34 = vld [vmem:[#allocation6 + $0x70] sm:$0xff] }
  0x19   :  { %140 = vmatpush.msra.mxu1 %v125_v13  ;;  %176 = vmatpush.msra.mxu2 %v171_v33  ;;  %v169_v35 = vld [vmem:[#allocation6 + $0x68] sm:$0xff]  ;;  %v168_v36 = vld [vmem:[#allocation6 + $0x60] sm:$0xff]  ;;  %v167_v37 = vld [vmem:[#allocation6 + $0x58] sm:$0xff] }
  0x1a   :  { %100 = vmatpush.msra.mxu0 %v83_v10  ;;  %v166_v38 = vld [vmem:[#allocation6 + $0x50] sm:$0xff]  ;;  %v165_v39 = vld [vmem:[#allocation6 + $0x48] sm:$0xff]  ;;  %v164_v40 = vld [vmem:[#allocation6 + $0x40] sm:$0xff] }
  0x1b   :  { %141 = vmatpush.msra.mxu1 %v124_v15  ;;  %177 = vmatpush.msra.mxu2 %v170_v34  ;;  %v163_v41 = vld [vmem:[#allocation6 + $0x38] sm:$0xff]  ;;  %v162_v42 = vld [vmem:[#allocation6 + $0x30] sm:$0xff]  ;;  %v161_v43 = vld [vmem:[#allocation6 + $0x28] sm:$0xff] }
  0x1c   :  { %101 = vmatpush.msra.mxu0 %v82_v12  ;;  %v160_v44 = vld [vmem:[#allocation6 + $0x20] sm:$0xff]  ;;  %v159_v45 = vld [vmem:[#allocation6 + $0x18] sm:$0xff]  ;;  %v158_v50 = vld [vmem:[#allocation6 + $0x10] sm:$0xff] }
  0x1d   :  { %142 = vmatpush.msra.mxu1 %v123_v17  ;;  %178 = vmatpush.msra.mxu2 %v169_v35  ;;  %v208_v46 = vld [vmem:[%s358_s2] ss:$0 sm:$0xff]  ;;  %v157_v51 = vld [vmem:[#allocation6 + $0x8] sm:$0xff] }
  0x1e   :  { %102 = vmatpush.msra.mxu0 %v81_v14  ;;  %v156_v52 = vld [vmem:[#allocation6] sm:$0xff] }
  0x1f   :  { %143 = vmatpush.msra.mxu1 %v122_v19  ;;  %179 = vmatpush.msra.mxu2 %v168_v36  ;;  %v209_v53 = vld [vmem:[%s360_s4] ss:$0 sm:$0xff] }
  0x20   :  { %103 = vmatpush.msra.mxu0 %v80_v16  ;;  %v210_v57 = vld [vmem:[%s362_s6] ss:$0 sm:$0xff] }
  0x21   :  { %144 = vmatpush.msra.mxu1 %v121_v21  ;;  %180 = vmatpush.msra.mxu2 %v167_v37 }
  0x22   :  { %104 = vmatpush.msra.mxu0 %v79_v18 }
  0x23   :  { %145 = vmatpush.msra.mxu1 %v120_v23  ;;  %181 = vmatpush.msra.mxu2 %v166_v38 }
  0x24   :  { %105 = vmatpush.msra.mxu0 %v78_v20 }
  0x25   :  { %146 = vmatpush.msra.mxu1 %v119_v25  ;;  %182 = vmatpush.msra.mxu2 %v165_v39 }
  0x26   :  { %106 = vmatpush.msra.mxu0 %v77_v22 }
  0x27   :  { %147 = vmatpush.msra.mxu1 %v118_v27  ;;  %183 = vmatpush.msra.mxu2 %v164_v40 }
  0x28   :  { %107 = vmatpush.msra.mxu0 %v76_v24 }
  0x29   :  { %148 = vmatpush.msra.mxu1 %v117_v30  ;;  %184 = vmatpush.msra.mxu2 %v163_v41 }
  0x2a   :  { %108 = vmatpush.msra.mxu0 %v75_v26 }
  0x2b   :  { %149 = vmatpush.msra.mxu1 %v116_v31  ;;  %185 = vmatpush.msra.mxu2 %v162_v42 }
  0x2c   :  { %109 = vmatpush.msra.mxu0 %v74_v28 }
  0x2d   :  { %110 = vmatmul.f32.vlgmr.msra.gmra.mxu0 %v73_v29  ;;  %150 = vmatpush.msra.mxu1 %v115_v32 }
  0x2e   :  { %186 = vmatpush.msra.mxu2 %v161_v43 }
  0x30   :  { %187 = vmatpush.msra.mxu2 %v160_v44 }
  0x32   :  { %188 = vmatpush.msra.mxu2 %v159_v45 }
  0x34   :  { %189 = vmatpush.msra.mxu2 %v158_v50 }
  0x36   :  { %190 = vmatpush.msra.mxu2 %v157_v51 }
  0x38   :  { %191 = vmatpush.msra.mxu2 %v156_v52 }
  0xaa   :  { %v111_v47 = vpop.f32.mrf.mxu0 }
  0xab   :  { %v112_v48 = vadd.f32 %v208_v46, %v111_v47 }
  0xad   :  { %v114_v49 = vmax.f32 %v112_v48, 0.0 }
  0xaf   :  { %151 = vmatmul.f32.vlgmr.msra.gmra.mxu1 %v114_v49 }
 0x12c   :  { %v152_v54 = vpop.f32.mrf.mxu1 }
 0x12d   :  { %v153_v55 = vadd.f32 %v209_v53, %v152_v54 }
 0x12f   :  { %v155_v56 = vmax.f32 %v153_v55, 0.0 }
 0x131   :  { %192 = vmatmul.f32.vlgmr.msra.gmra.mxu2 %v155_v56 }
 0x1b4   :  { %v193_v58 = vpop.f32.mrf.mxu2 }
 0x1b5   :  { %v194_v59 = vadd.f32 %v210_v57, %v193_v58 }
 0x1b7   :  { %196 = vst [vmem:[%s363_s7] sm:$0xff] %v194_v59 }
 0x1b8   :  { %201 = vsyncpa [#allocation3], 1 }
 0x1b9   :  { %202 = vsyncpa [#allocation5], 1 }

</bundles_post_ra>
